<compile_context>
chip_gen: v5e
topology: v5e:2x2
jax: 0.10.0
libtpu: 0.0.40
codegen_flags: <defaults>
</compile_context>

<pallas_src>
import functools
import math

import jax
import jax.numpy as jnp
from jax.experimental import pallas as pl
from jax.experimental.pallas import tpu as pltpu


def _round_up(x, m):
    return ((x + m - 1) // m) * m


def single_model_kernel(tau, k_classes,
                        x_ref, g_ref,
                        wenc_ref, benc_ref,
                        w1_ref, b1_ref,
                        w2_ref, b2_ref,
                        wdec_ref, bdec_ref,
                        out_ref, kl_ref):
    del tau  # tau > 0 does not change the argmax; soft branch not needed forward.

    # ---- encoder: Conv1d(c_in, hid, kernel_size=seg_len) == matmul on flat x ----
    lat = jnp.dot(x_ref[...], wenc_ref[...],
                  preferred_element_type=jnp.float32) + benc_ref[...]        # (Bt, hid) f32

    # ---- lin1 -> logits ----
    logits = jnp.dot(lat.astype(jnp.bfloat16), w1_ref[...],
                     preferred_element_type=jnp.float32) + b1_ref[...]       # (Bt, k) f32

    # ---- softmax / log-softmax via logsumexp (f32 elementwise) ----
    m = jnp.max(logits, axis=-1, keepdims=True)
    e = jnp.exp(logits - m)
    sum_e = jnp.sum(e, axis=-1, keepdims=True)
    q_y = e * pl.reciprocal(sum_e, approx=True)                              # (Bt, k)
    log_q_y = (logits - m) - jnp.log(sum_e)                                  # (Bt, k)

    # ---- gumbel_softmax(logits, tau, hard=True): forward value is the one-hot of
    #      argmax((logits+g)/tau) == argmax(logits+g) (softmax is monotone, tau>0) ----
    yl = logits + g_ref[...]
    ymax = jnp.max(yl, axis=-1, keepdims=True)
    col = jax.lax.broadcasted_iota(jnp.int32, yl.shape, dimension=1)
    sentinel = jnp.int32(2 ** 30)
    # argmax with first-occurrence tie-break (matches torch.argmax)
    argmax_idx = jnp.min(jnp.where(yl == ymax, col, sentinel),
                         axis=-1, keepdims=True)
    y_hard = (col == argmax_idx).astype(jnp.bfloat16)                        # (Bt, k) one-hot

    # ---- lin2 (one MXU matmul; cheaper than a serialized per-row gather) ----
    h = jnp.dot(y_hard, w2_ref[...],
                preferred_element_type=jnp.float32) + b2_ref[...]            # (Bt, hid) f32

    # ---- decoder: ConvTranspose1d(hid, c_out, kernel_size=seg_len) == matmul ----
    out = jnp.dot(h.astype(jnp.bfloat16), wdec_ref[...],
                  preferred_element_type=jnp.float32) + bdec_ref[...]        # (Bt, c_out*seg)
    out_ref[...] = out.astype(out_ref.dtype)

    # ---- per-row KL partials: sum_k q_y * (log_q_y + log(k)).  Batch mean is done
    #      wrapper-side so the grid axis stays fully parallel. ----
    log_k = jnp.float32(math.log(float(k_classes)))                          # folded at trace time
    kl_ref[...] = jnp.sum(q_y * (log_q_y + log_k), axis=-1, keepdims=True)   # (Bt, 1)


def single_model_forward(x, gumbel_noise, params, *, tau, k):
    """x: (B, c_in, seg_len) float32.  Returns (out (B, c_out, seg_len), kl scalar)."""
    B, c_in, seg_len = x.shape
    cs = c_in * seg_len
    hid = params["w_enc"].shape[1]
    c_out_seg = params["w_dec"].shape[1]
    c_out = c_out_seg // seg_len

    # Batch tiling: sublane-aligned tile, padded batch, one grid step per tile.
    B_TILE = 128 if B >= 128 else _round_up(B, 8)
    B_pad = _round_up(B, B_TILE)
    num_tiles = B_pad // B_TILE

    x_flat = x.reshape(B, cs)
    g = gumbel_noise
    if B_pad != B:
        pad = B_pad - B
        x_flat = jnp.pad(x_flat, ((0, pad), (0, 0)))
        g = jnp.pad(g, ((0, pad), (0, 0)))

    # bf16 MXU operands (halves weight + activation DMA); biases / elementwise stay f32.
    x_bf = x_flat.astype(jnp.bfloat16)
    w_enc = params["w_enc"].astype(jnp.bfloat16)
    w1 = params["w1"].astype(jnp.bfloat16)
    w2 = params["w2"].astype(jnp.bfloat16)
    w_dec = params["w_dec"].astype(jnp.bfloat16)
    b_enc, b1, b2, b_dec = (params["b_enc"], params["b1"],
                            params["b2"], params["b_dec"])

    kernel = functools.partial(single_model_kernel, tau, k)

    out_flat, kl_rows = pl.pallas_call(
        kernel,
        out_shape=(
            jax.ShapeDtypeStruct((B_pad, c_out_seg), jnp.float32),
            jax.ShapeDtypeStruct((B_pad, 1), jnp.float32),
        ),
        grid_spec=pltpu.PrefetchScalarGridSpec(
            num_scalar_prefetch=0,
            grid=(num_tiles,),
            in_specs=[
                # batch-tiled tensors
                pl.BlockSpec((B_TILE, cs), lambda i: (i, 0)),        # x
                pl.BlockSpec((B_TILE, k), lambda i: (i, 0)),         # gumbel noise
                # weights / biases: constant index_map -> stay VMEM-resident
                pl.BlockSpec((cs, hid), lambda i: (0, 0)),           # w_enc
                pl.BlockSpec((1, hid), lambda i: (0, 0)),            # b_enc
                pl.BlockSpec((hid, k), lambda i: (0, 0)),            # w1
                pl.BlockSpec((1, k), lambda i: (0, 0)),              # b1
                pl.BlockSpec((k, hid), lambda i: (0, 0)),            # w2
                pl.BlockSpec((1, hid), lambda i: (0, 0)),            # b2
                pl.BlockSpec((hid, c_out_seg), lambda i: (0, 0)),    # w_dec
                pl.BlockSpec((1, c_out_seg), lambda i: (0, 0)),      # b_dec
            ],
            out_specs=[
                pl.BlockSpec((B_TILE, c_out_seg), lambda i: (i, 0)),  # reconstruction
                pl.BlockSpec((B_TILE, 1), lambda i: (i, 0)),          # per-row KL partials
            ],
        ),
        compiler_params=pltpu.CompilerParams(
            dimension_semantics=("parallel",),
        ),
    )(x_bf, g, w_enc, b_enc, w1, b1, w2, b2, w_dec, b_dec)

    out = out_flat[:B].reshape(B, c_out, seg_len)
    kl = jnp.sum(kl_rows[:B, 0]) / jnp.float32(B)
    return out, kl


def init_params(key, c_in, seg_len, hid, k):
    """Deterministic init matching nn.Linear / nn.Conv1d default uniform(-1/sqrt(fan_in), ...)."""
    ks = jax.random.split(key, 8)

    def u(kk, shape, fan_in):
        bound = 1.0 / jnp.sqrt(jnp.float32(fan_in))
        return jax.random.uniform(kk, shape, jnp.float32, -bound, bound)

    c_out = c_in
    return {
        # encoder: Conv1d(c_in, hid, kernel_size=seg_len), flattened as (c_in*seg_len, hid)
        "w_enc": u(ks[0], (c_in * seg_len, hid), c_in * seg_len),
        "b_enc": u(ks[1], (1, hid), c_in * seg_len),
        # lin1: Linear(hid, k)
        "w1": u(ks[2], (hid, k), hid),
        "b1": u(ks[3], (1, k), hid),
        # lin2: Linear(k, hid)
        "w2": u(ks[4], (k, hid), k),
        "b2": u(ks[5], (1, hid), k),
        # decoder: ConvTranspose1d(hid, c_out, kernel_size=seg_len) -> (hid, c_out*seg_len)
        "w_dec": u(ks[6], (hid, c_out * seg_len), hid),
        "b_dec": u(ks[7], (1, c_out * seg_len), hid),
    }


if __name__ == "__main__":
    # Small shapes consistent with the module (c_in, seg_len scaled down; k kept lane-friendly).
    B, C_IN, SEG_LEN, HID, K, TAU = 2, 8, 16, 32, 128, 1.0

    root = jax.random.PRNGKey(0)
    k_x, k_p, k_g = jax.random.split(root, 3)

    x = jax.random.normal(k_x, (B, C_IN, SEG_LEN), jnp.float32)
    params = init_params(k_p, C_IN, SEG_LEN, HID, K)

    # Gumbel noise: -log(-log(U + eps) + eps), generated host-side (glue), consumed in-kernel.
    # TODO(synk): gradient of gumbel_softmax(hard=True) uses a straight-through estimator in
    # PyTorch; this kernel implements the forward value only.
    eps = 1e-20
    U = jax.random.uniform(k_g, (B, K), jnp.float32)
    gumbel_noise = -jnp.log(-jnp.log(U + eps) + eps)

    out, kl = single_model_forward(x, gumbel_noise, params, tau=TAU, k=K)
    jax.block_until_ready((out, kl))

    assert out.shape == (B, C_IN, SEG_LEN)
    assert out.dtype == jnp.float32
    assert kl.shape == ()
    assert bool(jnp.isfinite(kl))
    print("KERNEL_OK")
</pallas_src>

<mosaic_0001>
module attributes {stable_mosaic.version = 11 : i64} {
  func.func @single_model_kernel(%arg0: i32, %arg1: memref<8x128xbf16, #tpu.memory_space<vmem>>, %arg2: memref<8x128xf32, #tpu.memory_space<vmem>>, %arg3: memref<128x32xbf16, #tpu.memory_space<vmem>>, %arg4: memref<1x32xf32, #tpu.memory_space<vmem>>, %arg5: memref<32x128xbf16, #tpu.memory_space<vmem>>, %arg6: memref<1x128xf32, #tpu.memory_space<vmem>>, %arg7: memref<128x32xbf16, #tpu.memory_space<vmem>>, %arg8: memref<1x32xf32, #tpu.memory_space<vmem>>, %arg9: memref<32x128xbf16, #tpu.memory_space<vmem>>, %arg10: memref<1x128xf32, #tpu.memory_space<vmem>>, %arg11: memref<8x128xf32, #tpu.memory_space<vmem>>, %arg12: memref<8x1xf32, #tpu.memory_space<vmem>>) attributes {dimension_semantics = [#tpu.dimension_semantics<parallel>], iteration_bounds = array<i64: 1>, scalar_prefetch = 0 : i64, scratch_operands = 0 : i64, tpu.core_type = #tpu.core_type<tc>, window_params = [{transform_indices = @transform_0, window_bounds = array<i64: 8, 128>}, {transform_indices = @transform_1, window_bounds = array<i64: 8, 128>}, {pipeline_mode = #tpu.pipeline_mode<synchronous>, transform_indices = @transform_2, window_bounds = array<i64: 128, 32>}, {pipeline_mode = #tpu.pipeline_mode<synchronous>, transform_indices = @transform_3, window_bounds = array<i64: 1, 32>}, {pipeline_mode = #tpu.pipeline_mode<synchronous>, transform_indices = @transform_4, window_bounds = array<i64: 32, 128>}, {pipeline_mode = #tpu.pipeline_mode<synchronous>, transform_indices = @transform_5, window_bounds = array<i64: 1, 128>}, {pipeline_mode = #tpu.pipeline_mode<synchronous>, transform_indices = @transform_6, window_bounds = array<i64: 128, 32>}, {pipeline_mode = #tpu.pipeline_mode<synchronous>, transform_indices = @transform_7, window_bounds = array<i64: 1, 32>}, {pipeline_mode = #tpu.pipeline_mode<synchronous>, transform_indices = @transform_8, window_bounds = array<i64: 32, 128>}, {pipeline_mode = #tpu.pipeline_mode<synchronous>, transform_indices = @transform_9, window_bounds = array<i64: 1, 128>}, {transform_indices = @transform_10, window_bounds = array<i64: 8, 128>}, {transform_indices = @transform_11, window_bounds = array<i64: 8, 1>}]} {
    %c0 = arith.constant 0 : index
    %c0_0 = arith.constant 0 : index
    %0 = vector.load %arg1[%c0, %c0_0] : memref<8x128xbf16, #tpu.memory_space<vmem>>, vector<8x128xbf16>
    %c0_1 = arith.constant 0 : index
    %c0_2 = arith.constant 0 : index
    %1 = vector.load %arg3[%c0_1, %c0_2] : memref<128x32xbf16, #tpu.memory_space<vmem>>, vector<128x32xbf16>
    %cst = arith.constant dense<0.000000e+00> : vector<8x32xf32>
    %2 = tpu.matmul %0, %1, %cst {dimension_numbers = #tpu.dot_dimension_numbers<[1], [0], [0], [1], [0, 0, 1, 1], [], []>} : vector<8x128xbf16>, vector<128x32xbf16>, vector<8x32xf32> -> vector<8x32xf32>
    %c0_3 = arith.constant 0 : index
    %c0_4 = arith.constant 0 : index
    %3 = vector.load %arg4[%c0_3, %c0_4] : memref<1x32xf32, #tpu.memory_space<vmem>>, vector<1x32xf32>
    %4 = vector.broadcast %3 : vector<1x32xf32> to vector<8x32xf32>
    %5 = arith.addf %2, %4 : vector<8x32xf32>
    %6 = arith.truncf %5 : vector<8x32xf32> to vector<8x32xbf16>
    %c0_5 = arith.constant 0 : index
    %c0_6 = arith.constant 0 : index
    %7 = vector.load %arg5[%c0_5, %c0_6] : memref<32x128xbf16, #tpu.memory_space<vmem>>, vector<32x128xbf16>
    %cst_7 = arith.constant dense<0.000000e+00> : vector<8x128xf32>
    %8 = tpu.matmul %6, %7, %cst_7 {dimension_numbers = #tpu.dot_dimension_numbers<[1], [0], [0], [1], [0, 0, 1, 1], [], []>} : vector<8x32xbf16>, vector<32x128xbf16>, vector<8x128xf32> -> vector<8x128xf32>
    %c0_8 = arith.constant 0 : index
    %c0_9 = arith.constant 0 : index
    %9 = vector.load %arg6[%c0_8, %c0_9] : memref<1x128xf32, #tpu.memory_space<vmem>>, vector<1x128xf32>
    %10 = vector.broadcast %9 : vector<1x128xf32> to vector<8x128xf32>
    %11 = arith.addf %8, %10 : vector<8x128xf32>
    %cst_10 = arith.constant dense<0xFF800000> : vector<8xf32>
    %12 = vector.multi_reduction <maximumf>, %11, %cst_10 [1] : vector<8x128xf32> to vector<8xf32>
    %13 = vector.shape_cast %12 : vector<8xf32> to vector<8x1xf32>
    %14 = vector.broadcast %13 : vector<8x1xf32> to vector<8x128xf32>
    %15 = arith.subf %11, %14 : vector<8x128xf32>
    %16 = math.exp %15 : vector<8x128xf32>
    %cst_11 = arith.constant dense<0.000000e+00> : vector<8xf32>
    %17 = vector.multi_reduction <add>, %16, %cst_11 [1] : vector<8x128xf32> to vector<8xf32>
    %18 = vector.shape_cast %17 : vector<8xf32> to vector<8x1xf32>
    %19 = tpu.reciprocal %18 {approx = true} : vector<8x1xf32> -> vector<8x1xf32>
    %20 = vector.broadcast %19 : vector<8x1xf32> to vector<8x128xf32>
    %21 = arith.mulf %16, %20 : vector<8x128xf32>
    %22 = vector.broadcast %13 : vector<8x1xf32> to vector<8x128xf32>
    %23 = arith.subf %11, %22 : vector<8x128xf32>
    %24 = math.log %18 : vector<8x1xf32>
    %25 = vector.broadcast %24 : vector<8x1xf32> to vector<8x128xf32>
    %26 = arith.subf %23, %25 : vector<8x128xf32>
    %c0_12 = arith.constant 0 : index
    %c0_13 = arith.constant 0 : index
    %27 = vector.load %arg2[%c0_12, %c0_13] : memref<8x128xf32, #tpu.memory_space<vmem>>, vector<8x128xf32>
    %28 = arith.addf %11, %27 : vector<8x128xf32>
    %cst_14 = arith.constant dense<0xFF800000> : vector<8xf32>
    %29 = vector.multi_reduction <maximumf>, %28, %cst_14 [1] : vector<8x128xf32> to vector<8xf32>
    %30 = vector.shape_cast %29 : vector<8xf32> to vector<8x1xf32>
    %31 = tpu.iota {dimensions = array<i32: 1>} : vector<8x128xi32>
    %32 = vector.broadcast %30 : vector<8x1xf32> to vector<8x128xf32>
    %33 = arith.cmpf oeq, %28, %32 : vector<8x128xf32>
    %c1073741824_i32 = arith.constant 1073741824 : i32
    %34 = vector.broadcast %c1073741824_i32 : i32 to vector<8x128xi32>
    %35 = arith.select %33, %31, %34 : vector<8x128xi1>, vector<8x128xi32>
    %cst_15 = arith.constant dense<2147483647> : vector<8xi32>
    %36 = vector.multi_reduction <minsi>, %35, %cst_15 [1] : vector<8x128xi32> to vector<8xi32>
    %37 = vector.shape_cast %36 : vector<8xi32> to vector<8x1xi32>
    %38 = vector.broadcast %37 : vector<8x1xi32> to vector<8x128xi32>
    %39 = arith.cmpi eq, %31, %38 : vector<8x128xi32>
    %40 = arith.extui %39 : vector<8x128xi1> to vector<8x128xi32>
    %41 = arith.sitofp %40 : vector<8x128xi32> to vector<8x128xf32>
    %42 = arith.truncf %41 : vector<8x128xf32> to vector<8x128xbf16>
    %c0_16 = arith.constant 0 : index
    %c0_17 = arith.constant 0 : index
    %43 = vector.load %arg7[%c0_16, %c0_17] : memref<128x32xbf16, #tpu.memory_space<vmem>>, vector<128x32xbf16>
    %cst_18 = arith.constant dense<0.000000e+00> : vector<8x32xf32>
    %44 = tpu.matmul %42, %43, %cst_18 {dimension_numbers = #tpu.dot_dimension_numbers<[1], [0], [0], [1], [0, 0, 1, 1], [], []>} : vector<8x128xbf16>, vector<128x32xbf16>, vector<8x32xf32> -> vector<8x32xf32>
    %c0_19 = arith.constant 0 : index
    %c0_20 = arith.constant 0 : index
    %45 = vector.load %arg8[%c0_19, %c0_20] : memref<1x32xf32, #tpu.memory_space<vmem>>, vector<1x32xf32>
    %46 = vector.broadcast %45 : vector<1x32xf32> to vector<8x32xf32>
    %47 = arith.addf %44, %46 : vector<8x32xf32>
    %48 = arith.truncf %47 : vector<8x32xf32> to vector<8x32xbf16>
    %c0_21 = arith.constant 0 : index
    %c0_22 = arith.constant 0 : index
    %49 = vector.load %arg9[%c0_21, %c0_22] : memref<32x128xbf16, #tpu.memory_space<vmem>>, vector<32x128xbf16>
    %cst_23 = arith.constant dense<0.000000e+00> : vector<8x128xf32>
    %50 = tpu.matmul %48, %49, %cst_23 {dimension_numbers = #tpu.dot_dimension_numbers<[1], [0], [0], [1], [0, 0, 1, 1], [], []>} : vector<8x32xbf16>, vector<32x128xbf16>, vector<8x128xf32> -> vector<8x128xf32>
    %c0_24 = arith.constant 0 : index
    %c0_25 = arith.constant 0 : index
    %51 = vector.load %arg10[%c0_24, %c0_25] : memref<1x128xf32, #tpu.memory_space<vmem>>, vector<1x128xf32>
    %52 = vector.broadcast %51 : vector<1x128xf32> to vector<8x128xf32>
    %53 = arith.addf %50, %52 : vector<8x128xf32>
    %c0_26 = arith.constant 0 : index
    %c0_27 = arith.constant 0 : index
    %54 = vector.load %arg11[%c0_26, %c0_27] : memref<8x128xf32, #tpu.memory_space<vmem>>, vector<8x128xf32>
    tpu.vector_store %arg11[%c0_26, %c0_27], %53 {strides = array<i32>} : memref<8x128xf32, #tpu.memory_space<vmem>>, vector<8x128xf32>,
    %cst_28 = arith.constant 4.85203028 : f32
    %55 = vector.broadcast %cst_28 : f32 to vector<8x128xf32>
    %56 = arith.addf %26, %55 : vector<8x128xf32>
    %57 = arith.mulf %21, %56 : vector<8x128xf32>
    %cst_29 = arith.constant dense<0.000000e+00> : vector<8xf32>
    %58 = vector.multi_reduction <add>, %57, %cst_29 [1] : vector<8x128xf32> to vector<8xf32>
    %59 = vector.shape_cast %58 : vector<8xf32> to vector<8x1xf32>
    %c0_30 = arith.constant 0 : index
    %c0_31 = arith.constant 0 : index
    %60 = vector.load %arg12[%c0_30, %c0_31] : memref<8x1xf32, #tpu.memory_space<vmem>>, vector<8x1xf32>
    tpu.vector_store %arg12[%c0_30, %c0_31], %59 {strides = array<i32>} : memref<8x1xf32, #tpu.memory_space<vmem>>, vector<8x1xf32>,
    return
  }
  func.func @transform_0(%arg0: i32) -> (i32, i32) {
    %c0_i32 = arith.constant 0 : i32
    %c0_i32_0 = arith.constant 0 : i32
    return %arg0, %c0_i32 : i32, i32
  }
  func.func @transform_1(%arg0: i32) -> (i32, i32) {
    %c0_i32 = arith.constant 0 : i32
    %c0_i32_0 = arith.constant 0 : i32
    return %arg0, %c0_i32 : i32, i32
  }
  func.func @transform_2(%arg0: i32) -> (i32, i32) {
    %c0_i32 = arith.constant 0 : i32
    %c0_i32_0 = arith.constant 0 : i32
    %c0_i32_1 = arith.constant 0 : i32
    return %c0_i32, %c0_i32_0 : i32, i32
  }
  func.func @transform_3(%arg0: i32) -> (i32, i32) {
    %c0_i32 = arith.constant 0 : i32
    %c0_i32_0 = arith.constant 0 : i32
    %c0_i32_1 = arith.constant 0 : i32
    return %c0_i32, %c0_i32_0 : i32, i32
  }
  func.func @transform_4(%arg0: i32) -> (i32, i32) {
    %c0_i32 = arith.constant 0 : i32
    %c0_i32_0 = arith.constant 0 : i32
    %c0_i32_1 = arith.constant 0 : i32
    return %c0_i32, %c0_i32_0 : i32, i32
  }
  func.func @transform_5(%arg0: i32) -> (i32, i32) {
    %c0_i32 = arith.constant 0 : i32
    %c0_i32_0 = arith.constant 0 : i32
    %c0_i32_1 = arith.constant 0 : i32
    return %c0_i32, %c0_i32_0 : i32, i32
  }
  func.func @transform_6(%arg0: i32) -> (i32, i32) {
    %c0_i32 = arith.constant 0 : i32
    %c0_i32_0 = arith.constant 0 : i32
    %c0_i32_1 = arith.constant 0 : i32
    return %c0_i32, %c0_i32_0 : i32, i32
  }
  func.func @transform_7(%arg0: i32) -> (i32, i32) {
    %c0_i32 = arith.constant 0 : i32
    %c0_i32_0 = arith.constant 0 : i32
    %c0_i32_1 = arith.constant 0 : i32
    return %c0_i32, %c0_i32_0 : i32, i32
  }
  func.func @transform_8(%arg0: i32) -> (i32, i32) {
    %c0_i32 = arith.constant 0 : i32
    %c0_i32_0 = arith.constant 0 : i32
    %c0_i32_1 = arith.constant 0 : i32
    return %c0_i32, %c0_i32_0 : i32, i32
  }
  func.func @transform_9(%arg0: i32) -> (i32, i32) {
    %c0_i32 = arith.constant 0 : i32
    %c0_i32_0 = arith.constant 0 : i32
    %c0_i32_1 = arith.constant 0 : i32
    return %c0_i32, %c0_i32_0 : i32, i32
  }
  func.func @transform_10(%arg0: i32) -> (i32, i32) {
    %c0_i32 = arith.constant 0 : i32
    %c0_i32_0 = arith.constant 0 : i32
    return %arg0, %c0_i32 : i32, i32
  }
  func.func @transform_11(%arg0: i32) -> (i32, i32) {
    %c0_i32 = arith.constant 0 : i32
    %c0_i32_0 = arith.constant 0 : i32
    return %arg0, %c0_i32 : i32, i32
  }
}

</mosaic_0001>

<bundles_post_ra>
// kernel: tpu_custom_call.1
= control target key start
LH: loop header
LB: loop body
LE: loop exit
PB: predicated region body
PF: predicated region fallthrough
CT: control target
= control target key end

     0   :  { %s633_s0 = inlined_call_operand.vmem [shape: bf16[8,128], index: 0, kind: input, shape index: {}]   ;;  %s634_s1 = inlined_call_operand.vmem [shape: f32[8,128], index: 1, kind: input, shape index: {}]   ;;  %s635_s2 = inlined_call_operand.vmem [shape: bf16[128,32], index: 2, kind: input, shape index: {}]   ;;  %s636_s3 = inlined_call_operand.vmem [shape: f32[1,32], index: 3, kind: input, shape index: {}]   ;;  %s637_s4 = inlined_call_operand.vmem [shape: bf16[32,128], index: 4, kind: input, shape index: {}]   ;;  %s638_s5 = inlined_call_operand.vmem [shape: f32[1,128], index: 5, kind: input, shape index: {}]   ;;  %s639_s6 = inlined_call_operand.vmem [shape: bf16[128,32], index: 6, kind: input, shape index: {}]   ;;  %s640_s7 = inlined_call_operand.vmem [shape: f32[1,32], index: 7, kind: input, shape index: {}]   ;;  %s641_s8 = inlined_call_operand.vmem [shape: bf16[32,128], index: 8, kind: input, shape index: {}]   ;;  %s642_s9 = inlined_call_operand.vmem [shape: f32[1,128], index: 9, kind: input, shape index: {}]   ;;  %s643_s10 = inlined_call_operand.hbm [shape: f32[8,128], index: 10, kind: output, shape index: {0}]   ;;  %s644_s11 = inlined_call_operand.vmem [shape: f32[8,1], index: 11, kind: output, shape index: {1}]  }
   0x1   :  { %v434_v0 = vld [vmem:[%s635_s2 + $0x38] sm:$0xff]  ;;  %v433_v1 = vld [vmem:[%s635_s2 + $0x30] sm:$0xff]  ;;  %v436_v2 = vld [vmem:[%s637_s4 + $0x8] sm:$0xff] }
   0x2   :  { %108 = vmatpush.bf16.msra.mxu0 %v434_v0  ;;  %152 = vmatpush.bf16.msra.mxu1 %v436_v2 }
   0x3   :  { %17 = vsyncpa [#allocation3], 0  ;;  %v432_v3 = vld [vmem:[%s635_s2 + $0x28] sm:$0xff]  ;;  %v431_v4 = vld [vmem:[%s635_s2 + $0x20] sm:$0xff]  ;;  %vm142_vm0 = vcmask 261120   ;;  %v175_v22 = vlaneseq  ;;  %vm320_vm5 = vcmask 7168  }
   0x4   :  { %v430_v5 = vld [vmem:[%s635_s2 + $0x18] sm:$0xff]  ;;  %v429_v6 = vld [vmem:[%s635_s2 + $0x10] sm:$0xff]  ;;  %v428_v7 = vld [vmem:[%s635_s2 + $0x8] sm:$0xff]  ;;  %v485_v45 = vmov 1.0|1.0  }
   0x5   :  { %v427_v8 = vld [vmem:[%s635_s2] sm:$0xff]  ;;  %v176_v23 = vand.u32 127, %v175_v22  ;;  %v444_v28 = vld [vmem:[%s639_s6 + $0x38] sm:$0xff]  ;;  %v443_v29 = vld [vmem:[%s639_s6 + $0x30] sm:$0xff] }
   0x6   :  { %109 = vmatpush.bf16.msra.mxu0 %v433_v1  ;;  %v39_v9 = vld [vmem:[%s633_s0] sm:$0xf]  ;;  %265 = vmatpush.bf16.msra.mxu2 %v444_v28  ;;  %v442_v30 = vld [vmem:[%s639_s6 + $0x28] sm:$0xff]  ;;  %v440_v32 = vld [vmem:[%s639_s6 + $0x18] sm:$0xff]  ;;  %s486_s0 = smov [#allocation2]  }
   0x7   :  { %v435_v10 = vld [vmem:[%s637_s4] sm:$0xff]  ;;  %v439_v34 = vld [vmem:[%s639_s6 + $0x10] sm:$0xff]  ;;  %v438_v37 = vld [vmem:[%s639_s6 + $0x8] sm:$0xff]  ;;  %s327_s23 = sshll.u32 %s486_s0, 4  ;;  %s328_s23 = int_to_ptr.vmem [resolvable:$true] %s327_s23 }
   0x8   :  { %153 = vmatpush.bf16.msra.mxu1 %v435_v10  ;;  %v449_v11 = vld [vmem:[%s636_s3] ss:$0 sm:$0xff]  ;;  %v446_v50 = vld [vmem:[%s641_s8 + $0x8] sm:$0xff] }
   0x9   :  { %v450_v16 = vld [vmem:[%s638_s5] ss:$0 sm:$0xff]  ;;  %308 = vmatpush.bf16.msra.mxu3 %v446_v50  ;;  %s329_s5 = sshll.u32 %s643_s10, 4  ;;  %s330_s5 = int_to_ptr.hbm [resolvable:$true] %s329_s5 }
   0xa   :  { %110 = vmatpush.bf16.msra.mxu0 %v432_v3  ;;  %v171_v18 = vld [vmem:[%s634_s1] sm:$0xff]  ;;  %266 = vmatpush.bf16.msra.mxu2 %v443_v29 }
   0xb   :  { %v441_v31 = vld [vmem:[%s639_s6 + $0x20] sm:$0xff] }
   0xc   :  { %v437_v39 = vld [vmem:[%s639_s6] sm:$0xff] }
   0xd   :  { %v445_v51 = vld [vmem:[%s641_s8] sm:$0xff] }
   0xe   :  { %111 = vmatpush.bf16.msra.mxu0 %v431_v4  ;;  %267 = vmatpush.bf16.msra.mxu2 %v442_v30  ;;  %v451_v53 = vld [vmem:[%s640_s7] ss:$0 sm:$0xff] }
   0xf   :  { %309 = vmatpush.bf16.msra.mxu3 %v445_v51  ;;  %v452_v2 = vld [vmem:[%s642_s9] ss:$0 sm:$0xff] }
  0x12   :  { %112 = vmatpush.bf16.msra.mxu0 %v430_v5  ;;  %268 = vmatpush.bf16.msra.mxu2 %v441_v31 }
  0x16   :  { %113 = vmatpush.bf16.msra.mxu0 %v429_v6  ;;  %269 = vmatpush.bf16.msra.mxu2 %v440_v32 }
  0x1a   :  { %114 = vmatpush.bf16.msra.mxu0 %v428_v7  ;;  %270 = vmatpush.bf16.msra.mxu2 %v439_v34 }
  0x1e   :  { %115 = vmatpush.bf16.msra.mxu0 %v427_v8  ;;  %271 = vmatpush.bf16.msra.mxu2 %v438_v37 }
  0x21   :  { %116 = vmatmul.bf16.vlgmr.msra.gmra.mxu0 %v39_v9 }
  0x22   :  { %272 = vmatpush.bf16.msra.mxu2 %v437_v39 }
  0x9e   :  { %v117_v12 = vpop.f32.mrf.mxu0 }
  0x9f   :  { %v118_v13 = vadd.f32 %v449_v11, %v117_v12 }
  0xa1   :  { %v121_v14 = vpack.c.bf16 %v118_v13, %v118_v13 }
  0xa3   :  { %382 = vmatmul.msk.bf16.vlgmr.msra.gmra.mxu1 %vm142_vm0, %v121_v14 }
  0xa6   :  { %v119_v15 = vpop.f32.mrf.mxu0 }
 0x120   :  { %v155_v17 = vpop.f32.mrf.mxu1 }
 0x121   :  { %v156_v19 = vadd.f32 %v450_v16, %v155_v17 }
 0x123   :  { %v172_v20 = vadd.f32 %v171_v18, %v156_v19 }
 0x125   :  { %173 = vmax.xlane.f32.xlu0 %v172_v20 }
 0x128   :  { %v157_v21 = vpop.f32.mrf.mxu1 }
 0x198   :  { %v174_v24 = vpop.xlane.xlu0 %173 }
 0x199   :  { %vm177_vm1 = vcmp.eq.f32.partialorder %v172_v20, %v174_v24 }
 0x19a   :  { %v178_v25 = vsel %vm177_vm1, %v176_v23, 1073741824 }
 0x19b   :  { %v180_v26 = vshra.s32 %v178_v25, 16  ;;  %v179_v33 = vand.u32 65535, %v178_v25 }
 0x19d   :  { %v182_v27 = vcvt.s32.f32 %v180_v26  ;;  %v181_v36 = vcvt.s32.f32 %v179_v33 }
 0x19f   :  { %183 = vmin.xlane.f32.xlu0 %v182_v27 }
 0x212   :  { %v184_v35 = vpop.xlane.xlu0 %183 }
 0x213   :  { %vm185_vm2 = vcmp.eq.f32.partialorder %v182_v27, %v184_v35  ;;  %v190_v40 = vcvt.f32.s32 %v184_v35 }
 0x214   :  { %v186_v38 = vsel %vm185_vm2, %v181_v36, inf }
 0x215   :  { %187 = vmin.xlane.f32.xlu1 %v186_v38  ;;  %v191_v42 = vshll.u32 %v190_v40, 16 }
 0x21d   :  { %159 = vmax.xlane.f32.xlu1 %v156_v19 }
 0x288   :  { %v188_v41 = vpop.xlane.xlu1 %187 }
 0x289   :  { %v189_v43 = vcvt.f32.s32 %v188_v41 }
 0x28b   :  { %v192_v44 = vadd.s32 %v191_v42, %v189_v43 }
 0x28d   :  { %vm193_vm3 = vcmp.eq.s32.totalorder %v176_v23, %v192_v44 }
 0x28e   :  { %vm416_vm4 = vmpackc.low %vm193_vm3, %vm193_vm3 }
 0x28f   :  { %417 = vmatmul.msk.bf16.vlgmr.msra.gmra.mxu2 %vm416_vm4, %v485_v45 }
 0x290   :  { %v160_v46 = vpop.xlane.xlu1 %159 }
 0x291   :  { %v161_v47 = vsub.f32 %v156_v19, %v160_v46 }
 0x293   :  { %v162_v48 = vmul.f32 1.442695, %v161_v47 }
 0x295   :  { %453 = vpow2.f32 %v162_v48 }
 0x29b   :  { %v454_v49 = vpop.eup %453 }
 0x29c   :  { %164 = vadd.xlane.f32.xlu2 %v454_v49 }
 0x30f   :  { %v165_v52 = vpop.xlane.xlu2 %164 }
 0x310   :  { %455 = vlog2.f32 %v165_v52 }
 0x311   :  { %457 = vrcp.f32 %v165_v52 }
 0x312   :  { %v274_v54 = vpop.f32.mrf.mxu2 }
 0x313   :  { %v275_v55 = vadd.f32 %v451_v53, %v274_v54 }
 0x315   :  { %v278_v56 = vpack.c.bf16 %v275_v55, %v275_v55 }
 0x316   :  { %v456_v57 = vpop.eup %455 }
 0x317   :  { %426 = vmatmul.msk.bf16.vlgmr.msra.gmra.mxu3 %vm142_vm0, %v278_v56  ;;  %v169_v58 = vmul.f32 0.6931472, %v456_v57  ;;  %v458_v59 = vpop.eup %457 }
 0x318   :  { %v167_v62 = vmul.f32 %v458_v59, %v454_v49 }
 0x319   :  { %v170_v61 = vsub.f32 %v161_v47, %v169_v58 }
 0x31a   :  { %v276_v60 = vpop.f32.mrf.mxu2 }
 0x31b   :  { %v316_v63 = vadd.f32 4.8520303, %v170_v61 }
 0x31d   :  { %v317_v0 = vmul.f32 %v316_v63, %v167_v62 }
 0x31f   :  { %318 = vadd.xlane.f32.xlu2 %v317_v0 }
 0x392   :  { %v319_v1 = vpop.xlane.xlu2 %318 }
 0x393   :  { %321 = vst.msk [vmem:[%s644_s11] sm:$0xff] %vm320_vm5, %v319_v1 }
 0x39a   :  { %v311_v3 = vpop.f32.mrf.mxu3 }
 0x39b   :  { %v312_v4 = vadd.f32 %v452_v2, %v311_v3 }
 0x39d   :  { %315 = vst [vmem:[#allocation2] sm:$0xff] %v312_v4 }
 0x39e   :  { %332 = dma.vmem_to_hbm [thread:$0]  %s328_s23, 128, %s330_s5, [#allocation3]  }
 0x3a2   :  { %v313_v5 = vpop.f32.mrf.mxu3 }
 0x3a3   :  { %483 = dma.done.wait [#allocation3], 128  }
 0x3a4   :  { %484 = vsyncadd [#allocation3], 4294967168 }
 0x3a5   :  { %341 = vsyncpa [#allocation3], 1 }

</bundles_post_ra>
